<compile_context>
chip_gen: v5e
topology: v5e:2x2
jax: 0.10.0
libtpu: 0.0.40
codegen_flags: <defaults>
</compile_context>

<pallas_src>
import functools
import math

import jax
import jax.numpy as jnp
from jax.experimental import pallas as pl
from jax.experimental.pallas import tpu as pltpu


# ----------------------------------------------------------------------------
# In-kernel block reduction: (tile_m, tile_f) native-dtype block -> (1, tile_m)
# f32 row sums, produced lane-dense (rows live on the lane axis).
# ----------------------------------------------------------------------------
def _block_row_sums(x_ref, tile_f):
    f32 = jnp.float32
    if tile_f > 128:
        # Stage 1 (VPU): accumulate lane-aligned 128-wide column slices in f32.
        num_full = tile_f // 128
        rem = tile_f - num_full * 128
        acc = x_ref[:, 0:128].astype(f32)
        for k in range(1, num_full):
            acc = acc + x_ref[:, k * 128:(k + 1) * 128].astype(f32)
        # Stage 2 (MXU): tiny ones-dot over the pre-reduced 128 lanes gives a
        # lane-dense (1, tile_m) result with ~f32 accuracy (HIGHEST on a
        # 128-wide contraction is cheap).
        ones = jnp.ones((1, 128), dtype=f32)
        sums = jax.lax.dot_general(
            ones, acc, (((1,), (1,)), ((), ())),
            preferred_element_type=f32,
            precision=jax.lax.Precision.HIGHEST)
        if rem:
            tail = x_ref[:, num_full * 128:tile_f]
            ones_t = jnp.ones((1, rem), dtype=tail.dtype)
            prec = (jax.lax.Precision.HIGHEST if tail.dtype == f32
                    else jax.lax.Precision.DEFAULT)
            sums = sums + jax.lax.dot_general(
                ones_t, tail, (((1,), (1,)), ((), ())),
                preferred_element_type=f32, precision=prec)
        return sums
    else:
        # Feature axis is at most one vreg wide: no pre-reduction possible,
        # single ones-dot on the native-dtype block (HIGHEST only for f32).
        x = x_ref[...]
        ones = jnp.ones((1, tile_f), dtype=x.dtype)
        prec = (jax.lax.Precision.HIGHEST if x.dtype == f32
                else jax.lax.Precision.DEFAULT)
        return jax.lax.dot_general(
            ones, x, (((1,), (1,)), ((), ())),
            preferred_element_type=f32, precision=prec)


# ----------------------------------------------------------------------------
# Kernels.
# ----------------------------------------------------------------------------
def _row_mean_kernel_single(x_ref, o_ref, *, inv_n, tile_f):
    """Whole feature axis in one block: grid = (row_tiles,)."""
    sums = _block_row_sums(x_ref, tile_f)
    o_ref[...] = (sums * inv_n).astype(o_ref.dtype)


def _row_mean_kernel_split(x_ref, o_ref, acc_ref, *, inv_n, tile_f):
    """Feature axis split across grid axis 1 (reduction axis last)."""
    j = pl.program_id(1)

    @pl.when(j == 0)
    def _init():
        acc_ref[...] = jnp.zeros_like(acc_ref)

    acc_ref[...] += _block_row_sums(x_ref, tile_f)

    @pl.when(j == pl.num_programs(1) - 1)
    def _finalize():
        o_ref[...] = (acc_ref[...] * inv_n).astype(o_ref.dtype)


# ----------------------------------------------------------------------------
# Tile selection (generation-safe VMEM budget).
# ----------------------------------------------------------------------------
_TARGET_BLOCK_BYTES = 8 * 1024 * 1024      # per input block (x2 double-buffered)
_MAX_TILE_F = 8192                         # bounds the in-kernel 128-lane unroll
_MAX_TILE_M = 32768                        # bounds the (1, tile_m) output row
_SPLIT_TILE_M = 256                        # lane-dense rows in the F-split path
_MIN_HALF_BLOCK_BYTES = 2 * 1024 * 1024    # only halve rows if halves stay big
_VMEM_LIMIT_BYTES = 48 * 1024 * 1024       # < 64 MiB physical VMEM on v7x


def _pick_tiles(m_rows, n_feat, itemsize):
    budget = _TARGET_BLOCK_BYTES
    if n_feat <= _MAX_TILE_F and 8 * n_feat * itemsize <= budget:
        tile_f = int(n_feat)                           # whole F per block
    else:
        # F-split: choose the number of feature chunks first (bounds padding
        # waste), keep chunks lane-aligned and rows >= _SPLIT_TILE_M.
        max_f = min(_MAX_TILE_F,
                    max(128, (budget // (_SPLIT_TILE_M * itemsize)) // 128 * 128))
        n_splits = pl.cdiv(n_feat, max_f)
        tile_f = int(min(max_f, pl.cdiv(pl.cdiv(n_feat, n_splits), 128) * 128))

    tile_m = budget // max(1, tile_f * itemsize)
    tile_m = min(tile_m, _MAX_TILE_M)
    if tile_m >= 128:
        tile_m = (tile_m // 128) * 128                 # lane-dense output rows
    else:
        tile_m = max(8, (tile_m // 8) * 8)

    rows_pad8 = max(8, pl.cdiv(m_rows, 8) * 8)
    if tile_m >= rows_pad8:
        tile_m = rows_pad8                             # one row tile covers all M
        # Megacore (v7x): split into two row tiles so the "parallel" axis can
        # shard across both TensorCores, as long as each half-block still
        # amortizes the ~0.35us per-grid-step overhead.
        half = pl.cdiv(m_rows, 2)
        half = (pl.cdiv(half, 128) * 128) if half >= 128 else max(8, pl.cdiv(half, 8) * 8)
        if half < tile_m and half * tile_f * itemsize >= _MIN_HALF_BLOCK_BYTES:
            tile_m = half
    return int(tile_m), int(tile_f)


# ----------------------------------------------------------------------------
# Pallas entry point: [M, F] -> [M] row means.
# ----------------------------------------------------------------------------
def mean_lastdim_pallas(x2d: jax.Array, *, tile_m=None, tile_f=None) -> jax.Array:
    m_rows, n_feat = x2d.shape
    itemsize = jnp.dtype(x2d.dtype).itemsize
    auto_m, auto_f = _pick_tiles(m_rows, n_feat, itemsize)
    tile_m = int(tile_m) if tile_m is not None else auto_m
    tile_f = int(tile_f) if tile_f is not None else auto_f
    inv_n = 1.0 / float(n_feat)

    if n_feat % tile_f:
        # F-split only (tile_f < F): zero-pad the feature axis so partial sums
        # never read garbage columns (zeros are sum-neutral; divide by true F).
        pad = pl.cdiv(n_feat, tile_f) * tile_f - n_feat
        x2d = jnp.pad(x2d, ((0, 0), (0, pad)))

    n_row_tiles = pl.cdiv(m_rows, tile_m)
    n_f_tiles = pl.cdiv(x2d.shape[1], tile_f)
    out_shape = jax.ShapeDtypeStruct((n_row_tiles, tile_m), x2d.dtype)

    if n_f_tiles == 1:
        # Common path: no accumulator scratch, no init/finalize branches.
        kernel = functools.partial(_row_mean_kernel_single, inv_n=inv_n, tile_f=tile_f)
        out = pl.pallas_call(
            kernel,
            out_shape=out_shape,
            grid=(n_row_tiles,),
            in_specs=[pl.BlockSpec((tile_m, tile_f), lambda i: (i, 0))],
            out_specs=pl.BlockSpec((1, tile_m), lambda i: (i, 0)),
            compiler_params=pltpu.CompilerParams(
                dimension_semantics=("parallel",),
                vmem_limit_bytes=_VMEM_LIMIT_BYTES,
            ),
        )(x2d)
    else:
        kernel = functools.partial(_row_mean_kernel_split, inv_n=inv_n, tile_f=tile_f)
        out = pl.pallas_call(
            kernel,
            out_shape=out_shape,
            grid=(n_row_tiles, n_f_tiles),
            in_specs=[pl.BlockSpec((tile_m, tile_f), lambda i, j: (i, j))],
            out_specs=pl.BlockSpec((1, tile_m), lambda i, j: (i, 0)),
            scratch_shapes=[pltpu.VMEM((1, tile_m), jnp.float32)],
            compiler_params=pltpu.CompilerParams(
                dimension_semantics=("parallel", "arbitrary"),
                vmem_limit_bytes=_VMEM_LIMIT_BYTES,
            ),
        )(x2d)

    # (n_row_tiles, tile_m) -> flat rows; drop padded tail rows (garbage from
    # out-of-bounds row reads only ever lands in these discarded lanes).
    return out.reshape(-1)[:m_rows]


# ----------------------------------------------------------------------------
# Expression module equivalent (generic callable wrapper).
# ----------------------------------------------------------------------------
class Expression:
    """JAX/Pallas equivalent of the PyTorch Expression(nn.Module) wrapper:
    forward(input) = self.func(input)."""

    def __init__(self, func):
        self.func = func

    def __call__(self, x):
        return self.func(x)


_PALLAS_MIN_BYTES = 512 * 1024  # below this, launch overhead dwarfs the work


def pallas_mean_over_features(x: jax.Array, *, force_pallas: bool = False):
    """Implements `lambda x: x.mean(dim=-1)` for x of shape [..., F]."""
    *lead, n_feat = x.shape
    m_rows = math.prod(lead) if lead else 1
    nbytes = x.size * jnp.dtype(x.dtype).itemsize
    if not force_pallas and nbytes < _PALLAS_MIN_BYTES:
        # Tiny input: XLA's fused reduction beats fixed pallas_call overhead.
        return jnp.mean(x, axis=-1)
    out = mean_lastdim_pallas(x.reshape(m_rows, n_feat))
    return out.reshape(tuple(lead))


if __name__ == "__main__":
    key = jax.random.PRNGKey(0)
    k1, k2, k3, k4 = jax.random.split(key, 4)

    # Expression wrapper around the Pallas-backed func (force the Pallas path
    # so the kernel is exercised even at these tiny test shapes).
    expr = Expression(functools.partial(pallas_mean_over_features, force_pallas=True))

    # 1) f32, lane-aligned F=128: single-f-tile path, direct HIGHEST ones-dot.
    x1 = jax.random.normal(k1, (2, 4, 128), dtype=jnp.float32)
    y1 = jax.block_until_ready(expr(x1))
    r1 = jnp.mean(x1, axis=-1)
    assert y1.shape == r1.shape == (2, 4)
    assert jnp.allclose(y1, r1, atol=1e-5, rtol=1e-5)

    # 2) bf16, ragged F=200, 15 rows: VPU 128-lane pre-reduction + ragged tail,
    #    partial last row tile.
    x2 = jax.random.normal(k2, (3, 5, 200), dtype=jnp.float32).astype(jnp.bfloat16)
    y2 = jax.block_until_ready(expr(x2))
    r2 = jnp.mean(x2.astype(jnp.float32), axis=-1).astype(jnp.bfloat16)
    assert y2.shape == r2.shape == (3, 5)
    assert jnp.allclose(y2.astype(jnp.float32), r2.astype(jnp.float32),
                        atol=2e-2, rtol=2e-2)

    # 3) F-split path (reduction grid axis + f32 accumulator scratch), forced
    #    via small tile overrides so it is exercised at test size.
    x3 = jax.random.normal(k3, (16, 512), dtype=jnp.float32)
    y3 = jax.block_until_ready(mean_lastdim_pallas(x3, tile_m=16, tile_f=128))
    r3 = jnp.mean(x3, axis=-1)
    assert jnp.allclose(y3, r3, atol=1e-5, rtol=1e-5)

    # 4) F-split with ragged F (feature-axis zero pad) and a partial row tile.
    x4 = jax.random.normal(k4, (10, 300), dtype=jnp.float32)
    y4 = jax.block_until_ready(mean_lastdim_pallas(x4, tile_m=16, tile_f=128))
    r4 = jnp.mean(x4, axis=-1)
    assert jnp.allclose(y4, r4, atol=1e-5, rtol=1e-5)

    # 5) Default dispatch (tiny input -> jnp.mean fast path), same semantics.
    expr_auto = Expression(pallas_mean_over_features)
    y5 = jax.block_until_ready(expr_auto(x1))
    assert jnp.allclose(y5, r1, atol=1e-5, rtol=1e-5)

    print("KERNEL_OK")
</pallas_src>

<mosaic_0001>
module attributes {stable_mosaic.version = 11 : i64} {
  func.func @_row_mean_kernel_single(%arg0: i32, %arg1: memref<8x128xf32, #tpu.memory_space<vmem>>, %arg2: memref<1x8xf32, #tpu.memory_space<vmem>>) attributes {dimension_semantics = [#tpu.dimension_semantics<parallel>], iteration_bounds = array<i64: 1>, scalar_prefetch = 0 : i64, scratch_operands = 0 : i64, tpu.core_type = #tpu.core_type<tc>, window_params = [{transform_indices = @transform_0, window_bounds = array<i64: 8, 128>}, {transform_indices = @transform_1, window_bounds = array<i64: 1, 8>}]} {
    %c0 = arith.constant 0 : index
    %c0_0 = arith.constant 0 : index
    %0 = vector.load %arg1[%c0, %c0_0] : memref<8x128xf32, #tpu.memory_space<vmem>>, vector<8x128xf32>
    %cst = arith.constant 1.000000e+00 : f32
    %1 = vector.broadcast %cst : f32 to vector<1x128xf32>
    %cst_1 = arith.constant dense<0.000000e+00> : vector<1x8xf32>
    %2 = tpu.matmul %1, %0, %cst_1 {dimension_numbers = #tpu.dot_dimension_numbers<[1], [1], [0], [0], [0, 0, 1, 0], [], []>, precision = #tpu.contract_precision<fp32>} : vector<1x128xf32>, vector<8x128xf32>, vector<1x8xf32> -> vector<1x8xf32>
    %cst_2 = arith.constant 7.812500e-03 : f32
    %3 = vector.broadcast %cst_2 : f32 to vector<1x8xf32>
    %4 = arith.mulf %2, %3 : vector<1x8xf32>
    %c0_3 = arith.constant 0 : index
    %c0_4 = arith.constant 0 : index
    %5 = vector.load %arg2[%c0_3, %c0_4] : memref<1x8xf32, #tpu.memory_space<vmem>>, vector<1x8xf32>
    tpu.vector_store %arg2[%c0_3, %c0_4], %4 {strides = array<i32>} : memref<1x8xf32, #tpu.memory_space<vmem>>, vector<1x8xf32>,
    return
  }
  func.func @transform_0(%arg0: i32) -> (i32, i32) {
    %c0_i32 = arith.constant 0 : i32
    %c0_i32_0 = arith.constant 0 : i32
    return %arg0, %c0_i32 : i32, i32
  }
  func.func @transform_1(%arg0: i32) -> (i32, i32) {
    %c0_i32 = arith.constant 0 : i32
    %c0_i32_0 = arith.constant 0 : i32
    return %arg0, %c0_i32 : i32, i32
  }
}

</mosaic_0001>

<bundles_post_ra>
// kernel: tpu_custom_call.1
= control target key start
LH: loop header
LB: loop body
LE: loop exit
PB: predicated region body
PF: predicated region fallthrough
CT: control target
= control target key end

     0   :  { %6 = vsyncpa [#allocation3], 0  ;;  %s253_s0 = inlined_call_operand.hbm [shape: f32[8,128], index: 0, kind: input, shape index: {}]   ;;  %s254_s1 = inlined_call_operand.hbm [shape: f32[1,8], index: 1, kind: output, shape index: {}]  }
   0x1   :  { %7 = vsyncpa [#allocation4], 0  ;;  %s13_s8 = sshll.u32 %s253_s0, 4  ;;  %s233_s9 = smov [#allocation2]   ;;  %s14_s8 = int_to_ptr.hbm [resolvable:$true] %s13_s8 }
   0x2   :  { %s15_s10 = sshll.u32 %s233_s9, 4  ;;  %s16_s10 = int_to_ptr.vmem [resolvable:$true] %s15_s10 }
   0x3   :  { %18 = dma.hbm_to_vmem [thread:$0]  %s14_s8, 128, %s16_s10, [#allocation3]  }
   0x4   :  { %229 = dma.done.wait [#allocation3], 128  }
   0x5   :  { %230 = vsyncadd [#allocation3], 4294967168  ;;  %v23_v0 = vld [vmem:[#allocation2] sm:$0xff]  ;;  %v234_v4 = vmov 0.0   ;;  %v235_v7 = vmov 1.0   ;;  %s236_s0 = smov [#allocation5]  }
   0x6   :  { %v39_v1 = vand.u32 4294901760, %v23_v0  ;;  %s165_s11 = sshll.u32 %s236_s0, 4  ;;  %s167_s14 = sshll.u32 %s254_s1, 4  ;;  %vm158_vm0 = vcmask 57344   ;;  %s166_s11 = int_to_ptr.vmem [resolvable:$true] %s165_s11  ;;  %s168_s14 = int_to_ptr.hbm [resolvable:$true] %s167_s14 }
   0x8   :  { %v61_v2 = vsub.f32 %v23_v0, %v39_v1  ;;  %40 = vmatpush.xpose.msra.mxu0 %v39_v1  ;;  %108 = vmatpush.xpose.msra.mxu3 %v39_v1 }
   0xa   :  { %87 = vmatpush.xpose.msra.mxu2 %v61_v2  ;;  %v62_v3 = vand.u32 4294901760, %v61_v2 }
   0xb   :  { %41 = vmatmul.f32.vlgmr.msra.gmra.mxu0 %v234_v4  ;;  %109 = vmatmul.f32.vlgmr.msra.gmra.mxu3 %v234_v4 }
   0xc   :  { %v63_v5 = vsub.f32 %v61_v2, %v62_v3  ;;  %131 = vmatpush.xpose.msrb.mxu0 %v62_v3 }
   0xd   :  { %88 = vmatmul.f32.vlgmr.msra.gmra.mxu2 %v234_v4 }
   0xe   :  { %v64_v6 = vand.u32 4294901760, %v63_v5 }
  0x10   :  { %65 = vmatpush.xpose.msra.mxu1 %v64_v6 }
  0x13   :  { %66 = vmatmul.f32.vlgmr.msra.gmra.mxu1 %v235_v7  ;;  %132 = vmatmul.f32.vlgmr.msrb.gmra.mxu0 %v235_v7 }
  0x14   :  { %152 = vmatpush.xpose.msrb.mxu1 %v39_v1 }
  0x1b   :  { %153 = vmatmul.f32.vlgmr.msrb.gmra.mxu1 %v235_v7 }
  0x88   :  { %v42_v8 = vpop.f32.mrf.mxu0 }
  0x8e   :  { %v110_v12 = vpop.f32.mrf.mxu3 }
  0x90   :  { %v67_v9 = vpop.f32.mrf.mxu1  ;;  %v89_v10 = vpop.f32.mrf.mxu2 }
  0x91   :  { %v68_v11 = vadd.f32 %v67_v9, %v42_v8  ;;  %v133_v14 = vpop.f32.mrf.mxu0 }
  0x93   :  { %v90_v13 = vadd.f32 %v89_v10, %v68_v11 }
  0x95   :  { %v111_v15 = vadd.f32 %v110_v12, %v90_v13 }
  0x97   :  { %v134_v16 = vadd.f32 %v133_v14, %v111_v15 }
  0x98   :  { %v154_v17 = vpop.f32.mrf.mxu1 }
  0x99   :  { %v155_v18 = vadd.f32 %v154_v17, %v134_v16 }
  0x9b   :  { %v157_v19 = vmul.f32 0.0078125, %v155_v18 }
  0x9d   :  { %159 = vst.msk [vmem:[#allocation5] sm:$0x1] %vm158_vm0, %v157_v19 }
  0x9e   :  { %170 = dma.vmem_to_hbm [thread:$0]  %s166_s11, 16, %s168_s14, [#allocation4]  }
  0x9f   :  { %231 = dma.done.wait [#allocation4], 16  }
  0xa0   :  { %232 = vsyncadd [#allocation4], 4294967280 }
  0xa1   :  { %175 = vsyncpa [#allocation3], 1 }
  0xa2   :  { %176 = vsyncpa [#allocation4], 1 }

</bundles_post_ra>
